<compile_context>
chip_gen: v7x
topology: tpu7x:2x2x1
jax: 0.10.0
libtpu: 0.0.40
codegen_flags: <defaults>
</compile_context>

<pallas_src>
import functools

import jax
import jax.numpy as jnp
from jax import lax
from jax.experimental import pallas as pl
from jax.experimental.pallas import tpu as pltpu

_LANE = 128


def _round_up(x, m):
    return ((x + m - 1) // m) * m


def _pad2d(a, rows, cols):
    return jnp.zeros((rows, cols), a.dtype).at[: a.shape[0], : a.shape[1]].set(a)


def _vmem_limit_bytes():
    """~3/4 of physical VMEM, capped at 96 MiB (v5e/v6e); ~48 MiB on v7x; safe fallback."""
    try:
        cap = int(pltpu.get_tpu_info().vmem_capacity_bytes)
    except Exception:
        cap = 64 * 1024 * 1024          # v7x per-TC size: conservative everywhere
    return min((cap * 3) // 4, 96 * 1024 * 1024)


def _choose_tile(total, requested):
    """Multiple-of-128 tile, <= padded extent, and <= ceil(extent/2) so the parallel
    grid axis keeps >= 2 blocks (feeds both TensorCores on v7x)."""
    total_p = _round_up(max(int(total), 1), _LANE)
    t = min(_round_up(int(requested), _LANE), total_p)
    if total_p >= 2 * _LANE:
        t = min(t, _round_up(pl.cdiv(total_p, 2), _LANE))
    return max(t, _LANE)


# --------------------------- kernel E:  Ye = B @ H ------------------------------------
def _edge_agg_kernel(b_ref, h_ref, ye_ref, acc_ref, *, compute_dtype):
    """grid = (E_p//be, N_p//bn); axis 0 parallel (edge tiles), axis 1 reduction over N."""
    n = pl.program_id(1)

    @pl.when(n == 0)
    def _init():
        acc_ref[...] = jnp.zeros_like(acc_ref)

    # B tile is int8 in HBM; upcast in VMEM so the MXU runs a native bf16 (or f32) dot.
    acc_ref[...] += jnp.dot(b_ref[...].astype(compute_dtype), h_ref[...],
                            preferred_element_type=jnp.float32)

    @pl.when(n == pl.num_programs(1) - 1)
    def _finalize():
        ye_ref[...] = acc_ref[...].astype(ye_ref.dtype)


# -------------- kernel V:  out = ((1-a)*(S + B^T @ Ye) + a*X0) @ W3 + b3 --------------
def _vertex_agg_kernel(b_ref, ye_ref, s_ref, x0_ref, w3_ref, b3_ref, out_ref, acc_ref,
                       *, alpha, compute_dtype):
    """grid = (N_p//bn, E_p//be); axis 0 parallel (vertex tiles), axis 1 reduction over E.

    b_ref is a (be, bn) tile of the SAME [E_p, N_p] int8 incidence used in stage 1
    (index_map lambda n, e: (e, n)); its edge dim is contracted against Ye's edge dim,
    so no transposed copy of B is ever materialized in HBM.
    """
    e = pl.program_id(1)

    @pl.when(e == 0)
    def _init():
        acc_ref[...] = jnp.zeros_like(acc_ref)

    acc_ref[...] += lax.dot_general(
        b_ref[...].astype(compute_dtype), ye_ref[...],
        dimension_numbers=(((0,), (0,)), ((), ())),
        preferred_element_type=jnp.float32)

    @pl.when(e == pl.num_programs(1) - 1)
    def _finalize():
        xv = s_ref[...] + acc_ref[...]                      # S = deg*(X@W2a+b2), f32
        xmix = (1.0 - alpha) * xv + alpha * x0_ref[...]
        # Padded rows hold b3 (not zero) here; harmless — sliced off by the wrapper.
        out_ref[...] = (jnp.dot(xmix.astype(w3_ref.dtype), w3_ref[...],
                                preferred_element_type=jnp.float32)
                        + b3_ref[...]).astype(out_ref.dtype)


# ----------------------------------- wrapper ------------------------------------------
def equiv_set_conv(X, X0, vertex, edges, params, *, num_edges, alpha=0.5,
                   block_n=1024, block_e=1024, matmul_dtype=jnp.bfloat16):
    """EquivSetConv forward.  X:[N,Fin] f32, X0:[N,Fout] f32, vertex/edges:[nnz] int32."""
    N, Fin = X.shape
    Fout = params["W1"].shape[1]
    E = int(num_edges)

    f32 = jnp.float32
    md = jnp.dtype(matmul_dtype)
    itm = md.itemsize
    vmem_limit = _vmem_limit_bytes()

    # ---- tile / padding geometry (lane-dense everywhere) ----
    f_p = _round_up(Fout, _LANE)
    bn = _choose_tile(N, block_n)
    be = _choose_tile(E, block_e)

    # Defensive: shrink tiles until the double-buffered per-stage footprint fits VMEM.
    budget = int(0.75 * vmem_limit)

    def _footprint(bn_, be_):
        s1 = (2 * be_ * bn_ + 2 * bn_ * f_p * itm + 2 * be_ * f_p * itm + be_ * f_p * 4)
        s2 = (2 * be_ * bn_ + 2 * be_ * f_p * itm + 4 * bn_ * f_p * 4
              + 2 * bn_ * f_p * 4 + bn_ * f_p * 4 + f_p * f_p * itm + f_p * 4)
        return max(s1, s2)

    while _footprint(bn, be) > budget and (bn > _LANE or be > _LANE):
        if be > _LANE and (be >= bn or bn == _LANE):
            be = max(_LANE, (be // 2 // _LANE) * _LANE)
        else:
            bn = max(_LANE, (bn // 2 // _LANE) * _LANE)

    n_p = _round_up(N, bn)
    e_p = _round_up(E, be)
    gn, ge = n_p // bn, e_p // be

    # ---- incidence setup: single int8 [E_p, N_p] buffer (no f32 copy, no transpose).
    # Assumes per-(edge, vertex) pair multiplicity <= 127 (exact in int8).
    B_i8 = jnp.zeros((e_p, n_p), jnp.int8).at[edges, vertex].add(jnp.int8(1))
    deg = jnp.zeros((N, 1), f32).at[vertex, 0].add(1.0)             # [N, 1]

    # ---- parameter folding + hoisted per-vertex precomputes (tiny XLA matmuls) ----
    W1, b1 = params["W1"].astype(f32), params["b1"].astype(f32)
    W2, b2 = params["W2"].astype(f32), params["b2"].astype(f32)
    W3, b3 = params["W3"].astype(f32), params["b3"].astype(f32)
    W2a, W2b = W2[:Fin], W2[Fin:]
    hi = lax.Precision.HIGHEST
    W1b = jnp.dot(W1, W2b, precision=hi)                             # fold W1 @ W2b
    b1b = jnp.dot(b1[None, :], W2b, precision=hi)

    Xf = X.astype(f32)
    H = jnp.dot(Xf, W1b, precision=hi) + b1b                         # [N, Fout]
    S = deg * (jnp.dot(Xf, W2a, precision=hi) + b2[None, :])         # [N, Fout]

    Hp = _pad2d(H, n_p, f_p).astype(md)
    Sp = _pad2d(S, n_p, f_p)                                         # f32
    X0p = _pad2d(X0.astype(f32), n_p, f_p)                           # f32
    W3p = _pad2d(W3, f_p, f_p).astype(md)
    b3p = _pad2d(b3[None, :], 1, f_p)                                # f32

    compiler_params = pltpu.CompilerParams(
        dimension_semantics=("parallel", "arbitrary"),
        vmem_limit_bytes=int(vmem_limit),
    )

    # --------------------------- stage 1:  Ye = B @ H ----------------------------------
    flops_e = 2 * e_p * n_p * f_p
    bytes_e = e_p * n_p + ge * n_p * f_p * itm + e_p * f_p * itm

    ye = pl.pallas_call(
        functools.partial(_edge_agg_kernel, compute_dtype=md),
        out_shape=jax.ShapeDtypeStruct((e_p, f_p), md),
        grid=(ge, gn),
        in_specs=[
            pl.BlockSpec((be, bn), lambda e, n: (e, n)),             # B (int8)
            pl.BlockSpec((bn, f_p), lambda e, n: (n, 0)),            # H
        ],
        out_specs=pl.BlockSpec((be, f_p), lambda e, n: (e, 0)),
        scratch_shapes=[pltpu.VMEM((be, f_p), jnp.float32)],
        compiler_params=compiler_params,
        cost_estimate=pl.CostEstimate(flops=int(flops_e), transcendentals=0,
                                      bytes_accessed=int(bytes_e)),
    )(B_i8, Hp)

    # ------------- stage 2:  out = ((1-a)*(S + B^T @ Ye) + a*X0) @ W3 + b3 -------------
    flops_v = 2 * e_p * n_p * f_p + 2 * n_p * f_p * f_p
    bytes_v = (e_p * n_p + gn * e_p * f_p * itm
               + 2 * n_p * f_p * 4 + n_p * f_p * 4
               + f_p * f_p * itm + f_p * 4)

    kernel_v = functools.partial(_vertex_agg_kernel, alpha=float(alpha), compute_dtype=md)
    out_p = pl.pallas_call(
        kernel_v,
        out_shape=jax.ShapeDtypeStruct((n_p, f_p), jnp.float32),
        grid=(gn, ge),
        in_specs=[
            pl.BlockSpec((be, bn), lambda n, e: (e, n)),             # B (int8), transposed read
            pl.BlockSpec((be, f_p), lambda n, e: (e, 0)),            # Ye
            pl.BlockSpec((bn, f_p), lambda n, e: (n, 0)),            # S  (f32)
            pl.BlockSpec((bn, f_p), lambda n, e: (n, 0)),            # X0 (f32)
            pl.BlockSpec((f_p, f_p), lambda n, e: (0, 0)),           # W3
            pl.BlockSpec((1, f_p), lambda n, e: (0, 0)),             # b3
        ],
        out_specs=pl.BlockSpec((bn, f_p), lambda n, e: (n, 0)),
        scratch_shapes=[pltpu.VMEM((bn, f_p), jnp.float32)],
        compiler_params=compiler_params,
        cost_estimate=pl.CostEstimate(flops=int(flops_v), transcendentals=0,
                                      bytes_accessed=int(bytes_v)),
    )(B_i8, ye, Sp, X0p, W3p, b3p)

    return out_p[:N, :Fout]


# ------------------------------ pure-JAX reference ------------------------------------
def equiv_set_conv_ref(X, X0, vertex, edges, params, *, num_edges, alpha=0.5):
    H1 = X @ params["W1"] + params["b1"]
    Xve = H1[vertex]
    Xe = jax.ops.segment_sum(Xve, edges, num_segments=num_edges)
    Xev = Xe[edges]
    Xcat = jnp.concatenate([X[vertex], Xev], axis=-1)
    H2 = Xcat @ params["W2"] + params["b2"]
    Xv = jax.ops.segment_sum(H2, vertex, num_segments=X.shape[0])
    Xmix = (1.0 - alpha) * Xv + alpha * X0
    return Xmix @ params["W3"] + params["b3"]


# ----------------------------------------- main ---------------------------------------
if __name__ == "__main__":
    key = jax.random.PRNGKey(0)
    k = jax.random.split(key, 10)

    # Small but multi-tile shapes so the grids / accumulators are actually exercised.
    N, E, NNZ = 300, 200, 2000          # vertices, hyperedges, incidence pairs
    Fin, Fout = 32, 32                  # in_features == out_features (X0 residual)
    alpha = 0.5

    params = {
        "W1": 0.1 * jax.random.normal(k[0], (Fin, Fout), jnp.float32),
        "b1": 0.1 * jax.random.normal(k[1], (Fout,), jnp.float32),
        "W2": 0.1 * jax.random.normal(k[2], (Fin + Fout, Fout), jnp.float32),
        "b2": 0.1 * jax.random.normal(k[3], (Fout,), jnp.float32),
        "W3": 0.1 * jax.random.normal(k[4], (Fout, Fout), jnp.float32),
        "b3": 0.1 * jax.random.normal(k[5], (Fout,), jnp.float32),
    }

    X = jax.random.normal(k[6], (N, Fin), jnp.float32)
    X0 = jax.random.normal(k[7], (N, Fout), jnp.float32)
    vertex = jax.random.randint(k[8], (NNZ,), 0, N, dtype=jnp.int32)
    edges = jax.random.randint(k[9], (NNZ,), 0, E, dtype=jnp.int32)

    ref = equiv_set_conv_ref(X, X0, vertex, edges, params, num_edges=E, alpha=alpha)

    # f32 compute path with small tiles (tight correctness check, multi-step reduction).
    out = equiv_set_conv(X, X0, vertex, edges, params, num_edges=E, alpha=alpha,
                         block_n=128, block_e=128, matmul_dtype=jnp.float32)
    out = jax.block_until_ready(out)
    assert out.shape == (N, Fout)
    assert jnp.allclose(out, ref, rtol=1e-3, atol=1e-3), "f32 kernel mismatch vs reference"

    # Production path: int8 incidence in HBM, bf16 MXU operands, f32 accumulation.
    out_bf16 = equiv_set_conv(X, X0, vertex, edges, params, num_edges=E, alpha=alpha)
    out_bf16 = jax.block_until_ready(out_bf16)
    rel = jnp.linalg.norm(out_bf16 - ref) / jnp.linalg.norm(ref)
    assert rel < 2e-2, "bf16 kernel relative error too large"

    print("KERNEL_OK")
</pallas_src>

<mosaic_0001>
module attributes {stable_mosaic.version = 11 : i64} {
  func.func @_edge_agg_kernel(%arg0: i32, %arg1: i32, %arg2: memref<128x128xi8, #tpu.memory_space<vmem>>, %arg3: memref<128x128xf32, #tpu.memory_space<vmem>>, %arg4: memref<128x128xf32, #tpu.memory_space<vmem>>, %arg5: memref<128x128xf32, #tpu.memory_space<vmem>>) attributes {dimension_semantics = [#tpu.dimension_semantics<parallel>, #tpu.dimension_semantics<arbitrary>], iteration_bounds = array<i64: 2, 3>, scalar_prefetch = 0 : i64, scratch_operands = 1 : i64, tpu.core_type = #tpu.core_type<tc>, window_params = [{transform_indices = @transform_0, window_bounds = array<i64: 128, 128>}, {transform_indices = @transform_1, window_bounds = array<i64: 128, 128>}, {transform_indices = @transform_2, window_bounds = array<i64: 128, 128>}]} {
    %c0_i32 = arith.constant 0 : i32
    %0 = arith.cmpi eq, %arg1, %c0_i32 : i32
    %1 = arith.extui %0 : i1 to i32
    %c0_i32_0 = arith.constant 0 : i32
    %2 = arith.cmpi ne, %1, %c0_i32_0 : i32
    scf.if %2 {
      %cst_9 = arith.constant 0.000000e+00 : f32
      %13 = vector.broadcast %cst_9 : f32 to vector<128x128xf32>
      %c0_10 = arith.constant 0 : index
      %c0_11 = arith.constant 0 : index
      %14 = vector.load %arg5[%c0_10, %c0_11] : memref<128x128xf32, #tpu.memory_space<vmem>>, vector<128x128xf32>
      tpu.vector_store %arg5[%c0_10, %c0_11], %13 {strides = array<i32>} : memref<128x128xf32, #tpu.memory_space<vmem>>, vector<128x128xf32>,
    } else {
    }
    %c0 = arith.constant 0 : index
    %c0_1 = arith.constant 0 : index
    %3 = vector.load %arg5[%c0, %c0_1] : memref<128x128xf32, #tpu.memory_space<vmem>>, vector<128x128xf32>
    %c0_2 = arith.constant 0 : index
    %c0_3 = arith.constant 0 : index
    %4 = vector.load %arg2[%c0_2, %c0_3] : memref<128x128xi8, #tpu.memory_space<vmem>>, vector<128x128xi8>
    %5 = arith.sitofp %4 : vector<128x128xi8> to vector<128x128xf32>
    %c0_4 = arith.constant 0 : index
    %c0_5 = arith.constant 0 : index
    %6 = vector.load %arg3[%c0_4, %c0_5] : memref<128x128xf32, #tpu.memory_space<vmem>>, vector<128x128xf32>
    %cst = arith.constant dense<0.000000e+00> : vector<128x128xf32>
    %7 = tpu.matmul %5, %6, %cst {dimension_numbers = #tpu.dot_dimension_numbers<[1], [0], [0], [1], [0, 0, 1, 1], [], []>} : vector<128x128xf32>, vector<128x128xf32>, vector<128x128xf32> -> vector<128x128xf32>
    %8 = arith.addf %3, %7 : vector<128x128xf32>
    %c0_6 = arith.constant 0 : index
    %c0_7 = arith.constant 0 : index
    %9 = vector.load %arg5[%c0_6, %c0_7] : memref<128x128xf32, #tpu.memory_space<vmem>>, vector<128x128xf32>
    tpu.vector_store %arg5[%c0_6, %c0_7], %8 {strides = array<i32>} : memref<128x128xf32, #tpu.memory_space<vmem>>, vector<128x128xf32>,
    %c2_i32 = arith.constant 2 : i32
    %10 = arith.cmpi eq, %arg1, %c2_i32 : i32
    %11 = arith.extui %10 : i1 to i32
    %c0_i32_8 = arith.constant 0 : i32
    %12 = arith.cmpi ne, %11, %c0_i32_8 : i32
    scf.if %12 {
      %c0_9 = arith.constant 0 : index
      %c0_10 = arith.constant 0 : index
      %13 = vector.load %arg5[%c0_9, %c0_10] : memref<128x128xf32, #tpu.memory_space<vmem>>, vector<128x128xf32>
      %c0_11 = arith.constant 0 : index
      %c0_12 = arith.constant 0 : index
      %14 = vector.load %arg4[%c0_11, %c0_12] : memref<128x128xf32, #tpu.memory_space<vmem>>, vector<128x128xf32>
      tpu.vector_store %arg4[%c0_11, %c0_12], %13 {strides = array<i32>} : memref<128x128xf32, #tpu.memory_space<vmem>>, vector<128x128xf32>,
    } else {
    }
    return
  }
  func.func @transform_0(%arg0: i32, %arg1: i32) -> (i32, i32) {
    %c0_i32 = arith.constant 0 : i32
    return %arg0, %arg1 : i32, i32
  }
  func.func @transform_1(%arg0: i32, %arg1: i32) -> (i32, i32) {
    %c0_i32 = arith.constant 0 : i32
    %c0_i32_0 = arith.constant 0 : i32
    return %arg1, %c0_i32 : i32, i32
  }
  func.func @transform_2(%arg0: i32, %arg1: i32) -> (i32, i32) {
    %c0_i32 = arith.constant 0 : i32
    %c0_i32_0 = arith.constant 0 : i32
    return %arg0, %c0_i32 : i32, i32
  }
}

</mosaic_0001>

<bundles_post_ra>
// kernel: tpu_custom_call.1
= control target key start
LH: loop header
LB: loop body
LE: loop exit
PB: predicated region body
PF: predicated region fallthrough
CT: control target
= control target key end

     0   :  { %s1581_s0 = inlined_call_operand.hbm [shape: s8[256,384], index: 0, kind: input, shape index: {}]   ;;  %s1582_s1 = inlined_call_operand.hbm [shape: f32[384,128], index: 1, kind: input, shape index: {}]   ;;  %s1583_s2 = inlined_call_operand.hbm [shape: f32[256,128], index: 2, kind: output, shape index: {}]  }
   0x1   :  { %1596 = sst [smem:[#allocation17_spill]] %s1581_s0 }
   0x2   :  { %1597 = sst [smem:[#allocation18_spill]] %s1583_s2 }
   0x3   :  { %7 = vsyncpa [#allocation4], 0 }
   0x4   :  { %9 = vsyncpa [#allocation4 + $0x1], 0 }
   0x5   :  { %10 = vsyncpa [#allocation7], 0 }
   0x6   :  { %12 = vsyncpa [#allocation7 + $0x1], 0 }
   0x7   :  { %13 = vsyncpa [#allocation5], 0 }
   0x8   :  { %15 = vsyncpa [#allocation5 + $0x1], 0  ;;  %s1179_s9 = smov 0   ;;  %s1181_s10 = smov 0  }
   0x9   :  { %s1183_s11 = smov 0   ;;  %s1185_s12 = smov 0  }
   0xa   :  { %s1187_s13 = smov 0   ;;  %s1189_s14 = smov 0  }
   0xb   :  { %s1191_s15 = smov 0   ;;  %s1193_s16 = smov 0  }
   0xc   :  { %s1195_s17 = smov 0   ;;  %s1197_s18 = smov 0  }
   0xd   :  { %s1199_s19 = smov 0   ;;  %s1201_s20 = smov 0  }
   0xe   :  { %s1203_s21 = smov 0   ;;  %s1205_s22 = smov 0  }
   0xf LB: > { %1598 = sst [smem:[#allocation12_spill]] %s1141_s19  ;;  %s30_s23 = sadd.s32 1, %s1145_s20  ;;  %s1153_s22 = sphi %s1205_s22, %s21_s22   ;;  %s1149_s21 = sphi %s1203_s21, %s1628_s21   ;;  %s1145_s20 = sphi %s1201_s20, %s1627_s20   ;;  %s1141_s19 = sphi %s1199_s19, %s1626_s19   ;;  %s1137_s18 = sphi %s1197_s18, %s1625_s18   ;;  %s1133_s17 = sphi %s1195_s17, %s1638_s17   ;;  %s1129_s16 = sphi %s1193_s16, %s1637_s16   ;;  %s1125_s15 = sphi %s1191_s15, %s1636_s15   ;;  %s1121_s14 = sphi %s1189_s14, %s1635_s14   ;;  %s1117_s13 = sphi %s1187_s13, %s1634_s13   ;;  %s1113_s12 = sphi %s1185_s12, %s1633_s12   ;;  %s1109_s11 = sphi %s1183_s11, %s1632_s11   ;;  %s1105_s10 = sphi %s1181_s10, %s1631_s10   ;;  %s1101_s9 = sphi %s1179_s9, %s1630_s9  }
  0x10   : > { %1599 = sst [smem:[#allocation13_spill]] %s1145_s20  ;;  %s33_s24 = sadd.s32 1, %s1149_s21 }
  0x11   : > { %1600 = sst [smem:[#allocation14_spill]] %s1149_s21  ;;  %p31_p0 = scmp.ge.s32.totalorder %s30_s23, 3 }
  0x12   : > { %s42_s25 = sadd.s32 1, %s1133_s17  ;;  %p49_p1 = scmp.ne.s32.totalorder %s1133_s17, %s1129_s16 }
  0x13   : > { %p1588_p2 = scmp.eq.s32.totalorder %s1153_s22, 0  ;;  %s1640_s23 = smov (%p31_p0, %s30_s23), 0 }
  0x14   : > { %1601 = sst [smem:[#allocation15_spill]] %s1640_s23  ;;  %s1642_s24 = smov (!%p31_p0, %s33_s24), %s1149_s21 }
  0x15   : > { %s1260_s26 = ssub.s32 %s1145_s20, %s1640_s23  ;;  %p1264_p3 = por %p1588_p2, %p49_p1 }
  0x16   : > { %p35_p4 = scmp.ge.s32.totalorder %s1642_s24, 2  ;;  %s94_s28 = sadd.s32 1, %s1109_s11 }
  0x17   : > { %p1587_p7 = scmp.lt.s32.totalorder %s1153_s22, 6  ;;  %s131_s30 = sand.u32 1, %s1133_s17  }
  0x18   : > { %s1644_s24 = smov (%p35_p4, %s1642_s24), 0  ;;  %s649_s6 = sshll.u32 %s131_s30, 5 }
  0x19   : > { %1603 = sst [smem:[#allocation16_spill]] %s1644_s24  ;;  %s37_s29 = ssub.s32 %s1149_s21, %s1644_s24 }
  0x1a   : > { %s39_s3 = sor.u32 %s1260_s26, %s37_s29  ;;  %p92_p8 = scmp.eq.s32.totalorder %s37_s29, 0 }
  0x1b   : > { %p40_p9 = scmp.eq.s32.totalorder %s39_s3, 0  ;;  %s805_s7 = smul.u32 12, %s1149_s21 }
  0x1c   : > { %s1280_s4 = scalar_select %p92_p8, %s1109_s11, %s94_s28  }
  0x1d   : > { %s1283_s5 = scalar_select %p40_p9, %s1133_s17, %s42_s25  }
  0x1e   : > { %p1290_p10 = pnand %p1587_p7, %p1264_p3  ;;  %s141_s24 = sadd.s32 %s1145_s20, %s805_s7 }
  0x1f   : > { %s135_s23 = scalar_lea.vmem [#allocation3], %s649_s6  ;;  %s652_s19 = sshll.u32 %s141_s24, 7 }
  0x20   : > { %s144_s2 = sshll.u32 %s135_s23, 4  ;;  %s1605_s0 = sld [smem:[#allocation17_spill]]  ;;  %s1295_s2 = int_to_ptr.vmem [resolvable:$true] %s144_s2 }
  0x21   : > { %p656_p11 = scmp.ge.s32.totalorder %s1153_s22, 1  ;;  %s1303_s27 = scalar_lea.sflag [#allocation4], %s131_s30 }
  0x22   : > { %p945_p13 = pneg %p1290_p10 }
  0x26   : > { %s1300_s25 = scalar_lea.hbm %s1605_s0, %s652_s19  ;;  %s948_s19 = scalar_lea.hbm %s1605_s0, 3072 }
  0x27   : > { %s943_s3 = scalar_lea.hbm %s1300_s25, 512  ;;  %p949_p3 = scmp.lt.u32.totalorder %s1300_s25, %s1605_s0 }
  0x28   : > { %p944_p12 = scmp.ne.s32.totalorder %s1300_s25, %s943_s3  ;;  %p950_p4 = scmp.lt.u32.totalorder %s948_s19, %s943_s3 }
  0x29   : > { %p952_p9 = scmp.lt.u32.totalorder %s943_s3, %s1300_s25 }
  0x2a   : > { %p946_p0 = pnand %p945_p13, %p944_p12  ;;  %p951_p8 = por %p950_p4, %p949_p3 }
  0x2c   : > { %p947_p1 = pneg %p946_p0  ;;  %p953_p7 = por %p952_p9, %p951_p8 }
  0x2e   : > { %p954_p2 = pnand %p953_p7, %p947_p1 }
  0x30   : > { %957 = shalt.err (!%p954_p2)
}
  0x31   : > { %s958_s30 = scalar_lea.vmem %s1295_s2, 512  ;;  %s1155_s28 = smov [#allocation3]  }
  0x32   : > { %p959_p12 = scmp.ne.s32.totalorder %s1295_s2, %s958_s30  ;;  %s963_s29 = sshll.u32 %s1155_s28, 4  ;;  %s964_s29 = int_to_ptr.vmem [resolvable:$false] %s963_s29 }
  0x33   : > { %s965_s23 = scalar_lea.vmem %s964_s29, 1024  ;;  %p966_p6 = scmp.lt.s32.totalorder %s1295_s2, %s964_s29 }
  0x34   : > { %p961_p0 = pnand %p959_p12, %p945_p13  ;;  %p967_p3 = scmp.lt.s32.totalorder %s965_s23, %s958_s30 }
  0x36   : > { %p962_p5 = pneg %p961_p0  ;;  %p968_p4 = por %p967_p3, %p966_p6 }
  0x38   : > { %p969_p8 = pnand %p968_p4, %p962_p5 }
  0x3a   : > { %972 = shalt.err (!%p969_p8)
}
  0x3b   : > { %s1156_s3 = smov 384   ;;  %s1589_s24 = smov 128  }
  0x3c   : > { %s1590_s19 = smov 8   ;;  %p173_p2 = scmp.lt.s32.totalorder %s1153_s22, 7 }
  0x3d   : > { %815 = dma.hbm_to_vmem [thread:$0]  (!%p1290_p10), %s1300_s25, 512, %s1295_s2, %s1303_s27, %s1156_s3, %s1589_s24, %s1590_s19  }
  0x3e   : > { %p1336_p5 = pnand %p656_p11, %p173_p2  ;;  %s645_s7 = sadd.s32 4294967295, %s1153_s22  }
  0x3f   : > { %s646_s30 = sadd.s32 4294967294, %s1153_s22   ;;  %p56_p6 = scmp.eq.s32.totalorder %s645_s7, 0 }
  0x40   : > { %s68_s28 = sadd.s32 1, %s1121_s14  ;;  %p1607_p7 = scmp.eq.s32.totalorder %s1260_s26, 0 }
  0x41   : > { %p1608_p13 = scmp.ne.s32.totalorder %s1129_s16, %s1125_s15  ;;  %p75_p10 = scmp.ne.s32.totalorder %s1121_s14, %s1117_s13 }
  0x42   : > { %s1346_s29 = scalar_select %p1607_p7, %s1121_s14, %s68_s28  }
  0x43   : > { %p1351_p1 = por %p56_p6, %p1608_p13  ;;  %p81_p11 = scmp.ne.s32.totalorder %s1117_s13, %s1113_s12 }
  0x44   : > { %p104_p9 = scmp.ne.s32.totalorder %s1109_s11, %s1105_s10  ;;  %p1610_p12 = scmp.eq.s32.totalorder %s1153_s22, 0 }
  0x45   : > { %s1609_s8 = scalar_select %p1351_p1, 1, 0 }
  0x46   : > { %p77_p0 = por %p75_p10, %p1610_p12  ;;  %p105_p3 = scmp.eq.s32.totalorder %s645_s7, 5 }
  0x47   : > { %p1363_p4 = por %p81_p11, %p56_p6  ;;  %p110_p8 = scmp.ne.s32.totalorder %s1105_s10, %s1101_s9 }
  0x48   : > { %p1369_p2 = por %p105_p3, %p104_p9  ;;  %p111_p7 = scmp.eq.s32.totalorder %s646_s30, 5 }
  0x49   : > { %s1611_s2 = scalar_select %p1363_p4, 1, 0 }
  0x4a   : > { %s1612_s26 = scalar_select %p1369_p2, 1, 0 }
  0x4b   : > { %s154_s15 = sand.u32 1, %s1121_s14   ;;  %s667_s25 = sshll.u32 %s1145_s20, 11 }
  0x4c   : > { %p1375_p13 = por %p111_p7, %p110_p8  ;;  %s653_s12 = sshll.u32 %s154_s15, 7 }
  0x4d   : > { %s1382_s7 = scalar_lea.hbm %s1582_s1, %s667_s25  ;;  %p1614_p6 = scmp.lt.s32.totalorder %s1153_s22, 6 }
  0x4e   : > { %s1613_s27 = scalar_select %p1375_p13, 1, 0 }
  0x4f   : > { %p1386_p10 = pnand %p1614_p6, %p77_p0  ;;  %s158_s30 = scalar_lea.vmem [#allocation6], %s653_s12 }
  0x50   : > { %s165_s24 = sshll.u32 %s158_s30, 4  ;;  %s1392_s19 = scalar_lea.sflag [#allocation7], %s154_s15  ;;  %s1390_s24 = int_to_ptr.vmem [resolvable:$true] %s165_s24 }
  0x51   : > { %s973_s23 = scalar_lea.hbm %s1382_s7, 2048  ;;  %p975_p9 = pneg %p1386_p10 }
  0x52   : > { %p974_p11 = scmp.ne.s32.totalorder %s1382_s7, %s973_s23  ;;  %s978_s0 = scalar_lea.hbm %s1582_s1, 6144 }
  0x53   : > { %p979_p0 = scmp.lt.u32.totalorder %s1382_s7, %s1582_s1  ;;  %p980_p8 = scmp.lt.u32.totalorder %s978_s0, %s973_s23 }
  0x54   : > { %p976_p12 = pnand %p975_p9, %p974_p11  ;;  %p982_p6 = scmp.lt.u32.totalorder %s973_s23, %s1382_s7 }
  0x55   : > { %p981_p7 = por %p980_p8, %p979_p0 }
  0x56   : > { %p977_p3 = pneg %p976_p12 }
  0x57   : > { %p983_p13 = por %p982_p6, %p981_p7 }
  0x59   : > { %p984_p2 = pnand %p983_p13, %p977_p3 }
  0x5b   : > { %987 = shalt.err (!%p984_p2)
}
  0x5c   : > { %s988_s15 = scalar_lea.vmem %s1390_s24, 2048  ;;  %s1159_s12 = smov [#allocation6]  }
  0x5d   : > { %p989_p11 = scmp.ne.s32.totalorder %s1390_s24, %s988_s15  ;;  %s993_s30 = sshll.u32 %s1159_s12, 4  ;;  %s994_s30 = int_to_ptr.vmem [resolvable:$false] %s993_s30 }
  0x5e   : > { %s995_s20 = scalar_lea.vmem %s994_s30, 4096  ;;  %p996_p1 = scmp.lt.s32.totalorder %s1390_s24, %s994_s30 }
  0x5f   : > { %p991_p12 = pnand %p989_p11, %p975_p9  ;;  %p997_p0 = scmp.lt.s32.totalorder %s995_s20, %s988_s15 }
  0x61   : > { %p992_p4 = pneg %p991_p12  ;;  %p998_p8 = por %p997_p0, %p996_p1 }
  0x63   : > { %p999_p7 = pnand %p998_p8, %p992_p4 }
  0x65   : > { %1002 = shalt.err (!%p999_p7)
}
  0x66   : > { %s1616_s0 = smov 8   ;;  %s1617_s21 = smov 128  }
  0x67   : > { %818 = dma.hbm_to_vmem [thread:$0]  (!%p1386_p10), %s1382_s7, 2048, %s1390_s24, %s1392_s19, %s1617_s21, %s1617_s21, %s1616_s0  }
  0x68   : > { %177 = sbr.rel (%p1336_p5) target bundleno = 426 (0x1aa), region = 28  ;;  %s179_s23 = sand.u32 (!%p1336_p5), 1, %s1129_s16  }
  0x69   : > { %s657_s25 = sshll.u32 (!%p1336_p5), %s179_s23, 5  ;;  %s180_s3 = scalar_lea.sflag (!%p1336_p5), [#allocation4], %s179_s23 }
  0x6a   : > { %s1426_s15 = scalar_lea.vmem (!%p1336_p5), [#allocation3], %s657_s25  ;;  %p1618_p1 = scmp.ne.s32.totalorder (!%p1336_p5), %s1609_s8, 0 }
  0x6f   : > { %1088 = dma.done.wait (%p1618_p1), %s180_s3, 512  }
  0x70   : > { %1090 = vsyncadd (%p1618_p1), %s180_s3, 4294966784  ;;  %s188_s28 = sand.u32 1, %s1117_s13   ;;  %p1619_p5 = scmp.ne.s32.totalorder %s1611_s2, 0 }
  0x71   : > { %s658_s12 = sshll.u32 %s188_s28, 7  ;;  %s189_s24 = scalar_lea.sflag [#allocation7], %s188_s28 }
  0x72   : > { %s1433_s19 = scalar_lea.vmem [#allocation6], %s658_s12 }
  0x73   : > { %1092 = dma.done.wait (%p1619_p5), %s189_s24, 2048  }
  0x74   : > { %1094 = vsyncadd (%p1619_p5), %s189_s24, 4294965248  ;;  %s215_s6 = sand.u32 1, %s1105_s10   ;;  %p660_p4 = scmp.ne.s32.totalorder %s1137_s18, 0 }
  0x75   : > { %s659_s7 = sshll.u32 %s215_s6, 7  ;;  %v1160_v0 = vmov (!%p660_p4), 0.0  }
  0x76   : > { %s1442_s30 = scalar_lea.vmem [#allocation8], %s659_s7  ;;  %224 = sbr.rel (%p660_p4) target bundleno = 126 (0x7e), region = 40  ;;  %225 = vst [vmem:[#allocation2] sm:$0xff] (!%p660_p4), %v1160_v0  ;;  %226 = vst [vmem:[#allocation2 + $0x8] sm:$0xff] (!%p660_p4), %v1160_v0 }
  0x77   : > { %227 = vst [vmem:[#allocation2 + $0x10] sm:$0xff] (!%p660_p4), %v1160_v0  ;;  %228 = vst [vmem:[#allocation2 + $0x18] sm:$0xff] (!%p660_p4), %v1160_v0 }
  0x78   : > { %229 = vst [vmem:[#allocation2 + $0x20] sm:$0xff] (!%p660_p4), %v1160_v0  ;;  %230 = vst [vmem:[#allocation2 + $0x28] sm:$0xff] (!%p660_p4), %v1160_v0 }
  0x79   : > { %231 = vst [vmem:[#allocation2 + $0x30] sm:$0xff] (!%p660_p4), %v1160_v0  ;;  %232 = vst [vmem:[#allocation2 + $0x38] sm:$0xff] (!%p660_p4), %v1160_v0 }
  0x7a   : > { %233 = vst [vmem:[#allocation2 + $0x40] sm:$0xff] (!%p660_p4), %v1160_v0  ;;  %234 = vst [vmem:[#allocation2 + $0x48] sm:$0xff] (!%p660_p4), %v1160_v0 }
  0x7b   : > { %235 = vst [vmem:[#allocation2 + $0x50] sm:$0xff] (!%p660_p4), %v1160_v0  ;;  %236 = vst [vmem:[#allocation2 + $0x58] sm:$0xff] (!%p660_p4), %v1160_v0 }
  0x7c   : > { %237 = vst [vmem:[#allocation2 + $0x60] sm:$0xff] (!%p660_p4), %v1160_v0  ;;  %238 = vst [vmem:[#allocation2 + $0x68] sm:$0xff] (!%p660_p4), %v1160_v0 }
  0x7d   : > { %239 = vst [vmem:[#allocation2 + $0x70] sm:$0xff] %v1160_v0  ;;  %240 = vst [vmem:[#allocation2 + $0x78] sm:$0xff] %v1160_v0 }
  0x7e PF: > { %v293_v1 = vld [vmem:[%s1433_s19] sm:$0xff]  ;;  %v294_v2 = vld [vmem:[%s1433_s19 + $0x8] sm:$0xff]  ;;  %v295_v3 = vld [vmem:[%s1433_s19 + $0x10] sm:$0xff]  ;;  %p661_p2 = scmp.ne.s32.totalorder %s1137_s18, 2 }
  0x7f   : > { %v757_v4 = vpack.c.bf16 %v294_v2, %v293_v1  ;;  %v296_v5 = vld [vmem:[%s1433_s19 + $0x18] sm:$0xff]  ;;  %v297_v7 = vld [vmem:[%s1433_s19 + $0x20] sm:$0xff]  ;;  %v298_v8 = vld [vmem:[%s1433_s19 + $0x28] sm:$0xff] }
  0x80   : > { %v761_v6 = vpack.c.bf16 %v296_v5, %v295_v3  ;;  %v765_v9 = vpack.c.bf16 %v298_v8, %v297_v7  ;;  %v1452_v10 = vld [vmem:[%s1426_s15] sm:$0xff]  ;;  %v1455_v11 = vld [vmem:[%s1426_s15 + $0x10] sm:$0xff]  ;;  %v300_v13 = vld [vmem:[%s1433_s19 + $0x38] sm:$0xff] }
  0x81   : > { %758 = vmatprep.subr.bf16.mxu0 %v757_v4  ;;  %789 = vmatprep.subr.bf16.mxu1 %v757_v4  ;;  %v299_v12 = vld [vmem:[%s1433_s19 + $0x30] sm:$0xff]  ;;  %v261_v14 = vunpack.c.0.s8 %v1452_v10  ;;  %v269_v15 = vunpack.c.0.s8 %v1455_v11  ;;  %v301_v19 = vld [vmem:[%s1433_s19 + $0x40] sm:$0xff]  ;;  %v302_v20 = vld [vmem:[%s1433_s19 + $0x48] sm:$0xff]  ;;  %v262_v31 = vunpack.c.1.s8 %v1452_v10  ;;  %v270_v32 = vunpack.c.1.s8 %v1455_v11 }
  0x82   : > { %760 = vmatpush3.bf16.msra.mxu0 %v757_v4  ;;  %797 = vmatpush3.bf16.msra.mxu1 %v757_v4  ;;  %v769_v18 = vpack.c.bf16 %v300_v13, %v299_v12  ;;  %v773_v21 = vpack.c.bf16 %v302_v20, %v301_v19  ;;  %v303_v22 = vld [vmem:[%s1433_s19 + $0x50] sm:$0xff]  ;;  %v304_v23 = vld [vmem:[%s1433_s19 + $0x58] sm:$0xff]  ;;  %v305_v25 = vld [vmem:[%s1433_s19 + $0x60] sm:$0xff]  ;;  %v263_v33 = vunpack.c.2.s8 %v1452_v10  ;;  %v271_v34 = vunpack.c.2.s8 %v1455_v11 }
  0x83   : > { %762 = vmatprep.subr.bf16.mxu0 %v761_v6  ;;  %790 = vmatprep.subr.bf16.mxu1 %v761_v6  ;;  %v277_v16 = vcvt.s32.f32 %v261_v14  ;;  %v285_v17 = vcvt.s32.f32 %v269_v15  ;;  %v777_v24 = vpack.c.bf16 %v304_v23, %v303_v22  ;;  %v306_v26 = vld [vmem:[%s1433_s19 + $0x68] sm:$0xff]  ;;  %v307_v28 = vld [vmem:[%s1433_s19 + $0x70] sm:$0xff]  ;;  %v308_v29 = vld [vmem:[%s1433_s19 + $0x78] sm:$0xff]  ;;  %v278_v37 = vcvt.s32.f32 %v262_v31 }
  0x84   : > { %v781_v27 = vpack.c.bf16 %v306_v26, %v305_v25  ;;  %v785_v30 = vpack.c.bf16 %v308_v29, %v307_v28  ;;  %v258_v35 = vld [vmem:[%s1426_s15 + $0x8] sm:$0xff]  ;;  %v260_v36 = vld [vmem:[%s1426_s15 + $0x18] sm:$0xff]  ;;  %v286_v38 = vcvt.s32.f32 %v270_v32  ;;  %v264_v39 = vunpack.c.3.s8 %v1452_v10  ;;  %v241_v63 = vld [vmem:[#allocation2] sm:$0xff] }
  0x85   : > { %733 = vmatprep.mubr.f32.mxu0 %v277_v16  ;;  %745 = vmatprep.mubr.f32.mxu1 %v285_v17  ;;  %v272_v40 = vunpack.c.3.s8 %v1455_v11  ;;  %v279_v41 = vcvt.s32.f32 %v263_v33  ;;  %v287_v42 = vcvt.s32.f32 %v271_v34  ;;  %v265_v43 = vunpack.c.0.s8 %v258_v35  ;;  %v242_v61 = vld [vmem:[#allocation2 + $0x8] sm:$0xff]  ;;  %v249_v0 = vld [vmem:[#allocation2 + $0x40] sm:$0xff]  ;;  %v252_v10 = vld [vmem:[#allocation2 + $0x58] sm:$0xff] }
  0x86   : > { %764 = vmatpush3.bf16.msra.mxu0 %v761_v6  ;;  %798 = vmatpush3.bf16.msra.mxu1 %v761_v6  ;;  %v273_v44 = vunpack.c.0.s8 %v260_v36  ;;  %v280_v45 = vcvt.s32.f32 %v264_v39  ;;  %v266_v47 = vunpack.c.1.s8 %v258_v35  ;;  %v274_v48 = vunpack.c.1.s8 %v260_v36  ;;  %v250_v62 = vld [vmem:[#allocation2 + $0x48] sm:$0xff]  ;;  %v243_v11 = vld [vmem:[#allocation2 + $0x10] sm:$0xff]  ;;  %v245_v23 = vld [vmem:[#allocation2 + $0x20] sm:$0xff] }
  0x87   : > { %766 = vmatprep.subr.bf16.mxu0 %v765_v9  ;;  %791 = vmatprep.subr.bf16.mxu1 %v765_v9  ;;  %v288_v46 = vcvt.s32.f32 %v272_v40  ;;  %v281_v49 = vcvt.s32.f32 %v265_v43  ;;  %v267_v51 = vunpack.c.2.s8 %v258_v35  ;;  %v275_v52 = vunpack.c.2.s8 %v260_v36  ;;  %v251_v12 = vld [vmem:[#allocation2 + $0x50] sm:$0xff]  ;;  %v254_v22 = vld [vmem:[#allocation2 + $0x68] sm:$0xff]  ;;  %v248_v33 = vld [vmem:[#allocation2 + $0x38] sm:$0xff] }
  0x88   : > { %v289_v50 = vcvt.s32.f32 %v273_v44  ;;  %v282_v53 = vcvt.s32.f32 %v266_v47  ;;  %v290_v54 = vcvt.s32.f32 %v274_v48  ;;  %v268_v55 = vunpack.c.3.s8 %v258_v35  ;;  %v256_v34 = vld [vmem:[#allocation2 + $0x78] sm:$0xff]  ;;  %v247_v35 = vld [vmem:[#allocation2 + $0x30] sm:$0xff] }
  0x89   : > { %v276_v56 = vunpack.c.3.s8 %v260_v36  ;;  %v283_v57 = vcvt.s32.f32 %v267_v51  ;;  %v291_v58 = vcvt.s32.f32 %v275_v52  ;;  %v255_v36 = vld [vmem:[#allocation2 + $0x70] sm:$0xff] }
  0x8a   : > { %768 = vmatpush3.bf16.msra.mxu0 %v765_v9  ;;  %799 = vmatpush3.bf16.msra.mxu1 %v765_v9  ;;  %v284_v59 = vcvt.s32.f32 %v268_v55  ;;  %v244_v9 = vld [vmem:[#allocation2 + $0x18] sm:$0xff] }
  0x8b   : > { %770 = vmatprep.subr.bf16.mxu0 %v769_v18  ;;  %792 = vmatprep.subr.bf16.mxu1 %v769_v18  ;;  %v292_v60 = vcvt.s32.f32 %v276_v56 }
  0x8e   : > { %772 = vmatpush3.bf16.msra.mxu0 %v769_v18  ;;  %800 = vmatpush3.bf16.msra.mxu1 %v769_v18 }
  0x8f   : > { %774 = vmatprep.subr.bf16.mxu0 %v773_v21  ;;  %793 = vmatprep.subr.bf16.mxu1 %v773_v21 }
  0x92   : > { %776 = vmatpush3.bf16.msra.mxu0 %v773_v21  ;;  %801 = vmatpush3.bf16.msra.mxu1 %v773_v21  ;;  %v246_v21 = vld [vmem:[#allocation2 + $0x28] sm:$0xff] }
  0x93   : > { %778 = vmatprep.subr.bf16.mxu0 %v777_v24  ;;  %794 = vmatprep.subr.bf16.mxu1 %v777_v24 }
  0x96   : > { %780 = vmatpush3.bf16.msra.mxu0 %v777_v24  ;;  %802 = vmatpush3.bf16.msra.mxu1 %v777_v24  ;;  %v253_v24 = vld [vmem:[#allocation2 + $0x60] sm:$0xff] }
  0x97   : > { %782 = vmatprep.subr.bf16.mxu0 %v781_v27  ;;  %795 = vmatprep.subr.bf16.mxu1 %v781_v27 }
  0x9a   : > { %784 = vmatpush3.bf16.msra.mxu0 %v781_v27  ;;  %803 = vmatpush3.bf16.msra.mxu1 %v781_v27 }
  0x9b   : > { %786 = vmatprep.subr.bf16.mxu0 %v785_v30  ;;  %796 = vmatprep.subr.bf16.mxu1 %v785_v30 }
  0x9e   : > { %788 = vmatpush3.bf16.msra.mxu0 %v785_v30  ;;  %804 = vmatpush3.bf16.msra.mxu1 %v785_v30 }
  0xa1   : > { %734 = vmatmul.mubr.f32.vlgmr.msra.gmra.mrb[0].mxu0 %v278_v37  ;;  %746 = vmatmul.mubr.f32.vlgmr.msra.gmra.mrb[0].mxu1 %v286_v38 }
  0xa2   : > { %736 = vmatprep.mubr.f32.mxu0 %v279_v41  ;;  %748 = vmatprep.mubr.f32.mxu1 %v287_v42 }
  0xa5   : > { %737 = vmatmul.mubr.f32.gmra.mrb[2].mxu0 %v280_v45  ;;  %749 = vmatmul.mubr.f32.gmra.mrb[2].mxu1 %v288_v46 }
  0xa6   : > { %739 = vmatprep.mubr.f32.mxu0 %v281_v49  ;;  %751 = vmatprep.mubr.f32.mxu1 %v289_v50 }
  0xa9   : > { %740 = vmatmul.mubr.f32.gmra.mrb[4].mxu0 %v282_v53  ;;  %752 = vmatmul.mubr.f32.gmra.mrb[4].mxu1 %v290_v54 }
  0xaa   : > { %742 = vmatprep.mubr.f32.mxu0 %v283_v57  ;;  %754 = vmatprep.mubr.f32.mxu1 %v291_v58 }
  0xad   : > { %743 = vmatmul.mubr.f32.gmra.mrb[6].mxu0 %v284_v59  ;;  %755 = vmatmul.mubr.f32.gmra.mrb[6].mxu1 %v292_v60 }
 0x174   : > { %v735_v1 = vpop.f32.mrb[0].mxu0  ;;  %v747_v2 = vpop.f32.mrb[0].mxu1 }
 0x175   : > { %v455_v3 = vadd.f32 %v735_v1, %v242_v61  ;;  %v463_v4 = vadd.f32 %v747_v2, %v250_v62  ;;  %v375_v5 = vpop.f32.mrb[1].mxu0  ;;  %v415_v6 = vpop.f32.mrb[1].mxu1 }
 0x176   : > { %v454_v7 = vadd.f32 %v375_v5, %v241_v63  ;;  %v462_v8 = vadd.f32 %v415_v6, %v249_v0 }
 0x177   : > { %471 = vst [vmem:[#allocation2 + $0x8] sm:$0xff] %v455_v3  ;;  %479 = vst [vmem:[#allocation2 + $0x48] sm:$0xff] %v463_v4 }
 0x178   : > { %470 = vst [vmem:[#allocation2] sm:$0xff] %v454_v7  ;;  %478 = vst [vmem:[#allocation2 + $0x40] sm:$0xff] %v462_v8  ;;  %v738_v13 = vpop.f32.mrb[2].mxu0  ;;  %v750_v14 = vpop.f32.mrb[2].mxu1 }
 0x179   : > { %v457_v15 = vadd.f32 %v738_v13, %v244_v9  ;;  %v465_v16 = vadd.f32 %v750_v14, %v252_v10  ;;  %v385_v17 = vpop.f32.mrb[3].mxu0  ;;  %v425_v18 = vpop.f32.mrb[3].mxu1 }
 0x17a   : > { %v456_v19 = vadd.f32 %v385_v17, %v243_v11  ;;  %v464_v20 = vadd.f32 %v425_v18, %v251_v12 }
 0x17b   : > { %473 = vst [vmem:[#allocation2 + $0x18] sm:$0xff] %v457_v15  ;;  %481 = vst [vmem:[#allocation2 + $0x58] sm:$0xff] %v465_v16 }
 0x17c   : > { %472 = vst [vmem:[#allocation2 + $0x10] sm:$0xff] %v456_v19  ;;  %480 = vst [vmem:[#allocation2 + $0x50] sm:$0xff] %v464_v20  ;;  %v741_v25 = vpop.f32.mrb[4].mxu0  ;;  %v753_v26 = vpop.f32.mrb[4].mxu1 }
 0x17d   : > { %v459_v27 = vadd.f32 %v741_v25, %v246_v21  ;;  %v467_v28 = vadd.f32 %v753_v26, %v254_v22  ;;  %v395_v29 = vpop.f32.mrb[5].mxu0  ;;  %v435_v30 = vpop.f32.mrb[5].mxu1 }
 0x17e   : > { %v458_v31 = vadd.f32 %v395_v29, %v245_v23  ;;  %v466_v32 = vadd.f32 %v435_v30, %v253_v24  ;;  %489 = sbr.rel (%p661_p2) target bundleno = 398 (0x18e), region = 44  ;;  %v491_v46 = vld [vmem:[#allocation2 + $0x8] sm:$0xff] (!%p661_p2) }
 0x17f   : > { %475 = vst [vmem:[#allocation2 + $0x28] sm:$0xff] %v459_v27  ;;  %483 = vst [vmem:[#allocation2 + $0x68] sm:$0xff] %v467_v28  ;;  %v490_v45 = vld [vmem:[#allocation2] sm:$0xff] (!%p661_p2)  ;;  %v499_v54 = vld [vmem:[#allocation2 + $0x48] sm:$0xff] (!%p661_p2) }
 0x180   : > { %474 = vst [vmem:[#allocation2 + $0x20] sm:$0xff] %v458_v31  ;;  %482 = vst [vmem:[#allocation2 + $0x60] sm:$0xff] %v466_v32  ;;  %v744_v37 = vpop.f32.mrb[6].mxu0  ;;  %v756_v38 = vpop.f32.mrb[6].mxu1  ;;  %v498_v53 = vld [vmem:[#allocation2 + $0x40] sm:$0xff] (!%p661_p2) }
 0x181   : > { %v461_v39 = vadd.f32 %v744_v37, %v248_v33  ;;  %v469_v40 = vadd.f32 %v756_v38, %v256_v34  ;;  %v405_v41 = vpop.f32.mrb[7].mxu0  ;;  %v445_v42 = vpop.f32.mrb[7].mxu1  ;;  %506 = vst [vmem:[%s1442_s30] sm:$0xff] (!%p661_p2), %v490_v45  ;;  %507 = vst [vmem:[%s1442_s30 + $0x8] sm:$0xff] (!%p661_p2), %v491_v46 }
 0x182   : > { %v460_v43 = vadd.f32 %v405_v41, %v247_v35  ;;  %v468_v44 = vadd.f32 %v445_v42, %v255_v36  ;;  %v493_v48 = vld [vmem:[#allocation2 + $0x18] sm:$0xff] (!%p661_p2)  ;;  %514 = vst [vmem:[%s1442_s30 + $0x40] sm:$0xff] (!%p661_p2), %v498_v53  ;;  %515 = vst [vmem:[%s1442_s30 + $0x48] sm:$0xff] (!%p661_p2), %v499_v54 }
 0x183   : > { %477 = vst [vmem:[#allocation2 + $0x38] sm:$0xff] %v461_v39  ;;  %485 = vst [vmem:[#allocation2 + $0x78] sm:$0xff] %v469_v40  ;;  %v492_v47 = vld [vmem:[#allocation2 + $0x10] sm:$0xff] (!%p661_p2)  ;;  %v501_v56 = vld [vmem:[#allocation2 + $0x58] sm:$0xff] (!%p661_p2) }
 0x184   : > { %476 = vst [vmem:[#allocation2 + $0x30] sm:$0xff] %v460_v43  ;;  %484 = vst [vmem:[#allocation2 + $0x70] sm:$0xff] %v468_v44  ;;  %v500_v55 = vld [vmem:[#allocation2 + $0x50] sm:$0xff] (!%p661_p2) }
 0x185   : > { %508 = vst [vmem:[%s1442_s30 + $0x10] sm:$0xff] %v492_v47  ;;  %509 = vst [vmem:[%s1442_s30 + $0x18] sm:$0xff] %v493_v48 }
 0x186   : > { %v495_v50 = vld [vmem:[#allocation2 + $0x28] sm:$0xff]  ;;  %516 = vst [vmem:[%s1442_s30 + $0x50] sm:$0xff] %v500_v55  ;;  %517 = vst [vmem:[%s1442_s30 + $0x58] sm:$0xff] %v501_v56 }
 0x187   : > { %v494_v49 = vld [vmem:[#allocation2 + $0x20] sm:$0xff]  ;;  %511 = vst [vmem:[%s1442_s30 + $0x28] sm:$0xff] %v495_v50  ;;  %v503_v58 = vld [vmem:[#allocation2 + $0x68] sm:$0xff] }
 0x188   : > { %510 = vst [vmem:[%s1442_s30 + $0x20] sm:$0xff] %v494_v49  ;;  %v502_v57 = vld [vmem:[#allocation2 + $0x60] sm:$0xff]  ;;  %519 = vst [vmem:[%s1442_s30 + $0x68] sm:$0xff] %v503_v58 }
 0x189   : > { %518 = vst [vmem:[%s1442_s30 + $0x60] sm:$0xff] %v502_v57 }
 0x18a   : > { %v497_v52 = vld [vmem:[#allocation2 + $0x38] sm:$0xff] }
 0x18b   : > { %v496_v51 = vld [vmem:[#allocation2 + $0x30] sm:$0xff]  ;;  %513 = vst [vmem:[%s1442_s30 + $0x38] sm:$0xff] %v497_v52  ;;  %v505_v60 = vld [vmem:[#allocation2 + $0x78] sm:$0xff] }
 0x18c   : > { %512 = vst [vmem:[%s1442_s30 + $0x30] sm:$0xff] %v496_v51  ;;  %v504_v59 = vld [vmem:[#allocation2 + $0x70] sm:$0xff]  ;;  %521 = vst [vmem:[%s1442_s30 + $0x78] sm:$0xff] %v505_v60 }
 0x18d   : > { %520 = vst [vmem:[%s1442_s30 + $0x70] sm:$0xff] %v504_v59 }
 0x18e PF: > { %s1620_s18 = sld [smem:[#allocation12_spill]]  ;;  %s1621_s0 = sld [smem:[#allocation18_spill]] }
 0x18f   : > { %s536_s23 = sshll.u32 %s1442_s30, 4  ;;  %s1505_s25 = scalar_lea.sflag [#allocation5], %s215_s6  ;;  %s1501_s23 = int_to_ptr.vmem [resolvable:$true] %s536_s23 }
 0x190   : > { %s1003_s3 = scalar_lea.vmem %s1501_s23, 2048  ;;  %p1622_p10 = scmp.ne.s32.totalorder %s1612_s26, 0 }
 0x191   : > { %p1004_p13 = scmp.ne.s32.totalorder %s1501_s23, %s1003_s3  ;;  %s1161_s15 = smov [#allocation8]  }
 0x192   : > { %s1007_s28 = sshll.u32 %s1161_s15, 4  ;;  %s1008_s28 = int_to_ptr.vmem [resolvable:$false] %s1007_s28 }
 0x193   : > { %p1005_p9 = pnand %p1004_p13, %p1622_p10  ;;  %s1009_s12 = scalar_lea.vmem %s1008_s28, 4096 }
 0x194   : > { %s668_s8 = sshll.u32 %s1620_s18, 11  ;;  %p1010_p6 = scmp.lt.s32.totalorder %s1501_s23, %s1008_s28 }
 0x195   : > { %s1498_s21 = scalar_lea.hbm %s1621_s0, %s668_s8  ;;  %p1006_p3 = pneg %p1005_p9 }
 0x196   : > { %p1011_p11 = scmp.lt.s32.totalorder %s1009_s12, %s1003_s3 }
 0x198   : > { %p1012_p12 = por %p1011_p11, %p1010_p6 }
 0x19a   : > { %p1013_p0 = pnand %p1012_p12, %p1006_p3 }
 0x19c   : > { %1016 = shalt.err (!%p1013_p0)
}
 0x19d   : > { %s1017_s24 = scalar_lea.hbm %s1498_s21, 2048  ;;  %s1021_s7 = scalar_lea.hbm %s1621_s0, 4096 }
 0x19e   : > { %p1018_p8 = scmp.ne.s32.totalorder %s1498_s21, %s1017_s24  ;;  %p1022_p5 = scmp.lt.u32.totalorder %s1498_s21, %s1621_s0 }
 0x19f   : > { %p1023_p4 = scmp.lt.u32.totalorder %s1021_s7, %s1017_s24  ;;  %p1025_p13 = scmp.lt.u32.totalorder %s1017_s24, %s1498_s21 }
 0x1a0   : > { %p1019_p7 = pnand %p1018_p8, %p1622_p10 }
 0x1a1   : > { %p1024_p2 = por %p1023_p4, %p1022_p5 }
 0x1a2   : > { %p1020_p1 = pneg %p1019_p7 }
 0x1a3   : > { %p1026_p9 = por %p1025_p13, %p1024_p2 }
 0x1a5   : > { %p1027_p3 = pnand %p1026_p9, %p1020_p1 }
 0x1a7   : > { %1030 = shalt.err (!%p1027_p3)
}
 0x1a8   : > { %s1162_s8 = smov 128   ;;  %s1163_s2 = smov 8  }
 0x1a9   : > { %810 = dma.vmem_to_hbm [thread:$0]  (%p1622_p10), %s1501_s23, 2048, %s1498_s21, %s1505_s25, %s1162_s8, %s1162_s8, %s1163_s2  }
 0x1aa PF: > { %p824_p6 = scmp.ge.s32.totalorder %s1153_s22, 2  ;;  %s551_s20 = sand.u32 1, %s1101_s9  }
 0x1ab   : > { %p1623_p11 = scmp.ne.s32.totalorder %s1613_s27, 0  ;;  %s552_s3 = scalar_lea.sflag [#allocation5], %s551_s20 }
 0x1ad   : > { %p820_p12 = pnand %p824_p6, %p1623_p11 }
 0x1af   : > { %1096 = dma.done.wait (!%p820_p12), %s552_s3, 2048  }
 0x1b0   : > { %1098 = vsyncadd (!%p820_p12), %s552_s3, 4294965248  ;;  %s21_s22 = sadd.s32 1, %s1153_s22   ;;  %s1625_s18 = sld [smem:[#allocation13_spill]] }
 0x1b1   : > { %p1534_p0 = scmp.ge.s32.totalorder %s21_s22, 8   ;;  %s1626_s19 = sld [smem:[#allocation14_spill]] }
 0x1b2   : > { %s1627_s20 = sld [smem:[#allocation15_spill]]  ;;  %s1628_s21 = sld [smem:[#allocation16_spill]] }
 0x1b3   : > { %s1630_s9 = smov %s1105_s10  ;;  %s1631_s10 = smov %s1109_s11 }
 0x1b4   : > { %s1632_s11 = smov %s1280_s4  ;;  %s1633_s12 = smov %s1117_s13 }
 0x1b5   : > { %s1634_s13 = smov %s1121_s14  ;;  %s1635_s14 = smov %s1346_s29 }
 0x1b6   : > { %s1636_s15 = smov %s1129_s16  ;;  %s1637_s16 = smov %s1133_s17 }
 0x1b7   : > { %s1638_s17 = smov %s1283_s5  ;;  %20 = sbr.rel (!%p1534_p0) target bundleno = 15 (0xf), region = 94 }
 0x1be   :  { %557 = vsyncpa [#allocation4], 1 }
 0x1bf   :  { %559 = vsyncpa [#allocation4 + $0x1], 1 }
 0x1c0   :  { %560 = vsyncpa [#allocation7], 1 }
 0x1c1   :  { %562 = vsyncpa [#allocation7 + $0x1], 1 }
 0x1c2   :  { %563 = vsyncpa [#allocation5], 1 }
 0x1c3   :  { %565 = vsyncpa [#allocation5 + $0x1], 1 }

</bundles_post_ra>
